<compile_context>
chip_gen: v6e
topology: v6e:2x2x1
jax: 0.10.0
libtpu: 0.0.40
codegen_flags: <defaults>
</compile_context>

<pallas_src>
import functools

import jax
import jax.numpy as jnp
from jax.experimental import pallas as pl
from jax.experimental.pallas import tpu as pltpu

# ---- small synthetic config (consistent with LlamaModel.__init__) ----
VOCAB = 64
D_MODEL = 32
N_LAYERS = 2
N_HEADS = 4
N_KV_HEADS = 2
D_HEAD = 8            # N_HEADS * D_HEAD == D_MODEL
D_MLP = 64
ROPE_THETA = 10000.0
RMS_EPS = 1e-6
INIT_STD = 0.02

LANE = 128
DP = ((D_MODEL + LANE - 1) // LANE) * LANE   # padded d_model  -> 128
MP = ((D_MLP + LANE - 1) // LANE) * LANE     # padded d_mlp    -> 128
VP = ((VOCAB + LANE - 1) // LANE) * LANE     # padded vocab    -> 128
HD = N_HEADS * D_HEAD                        # 32  query-head lanes
KVD = N_KV_HEADS * D_HEAD                    # 16  kv-head lanes
GROUP = N_HEADS // N_KV_HEADS                # 2
QKW = HD + KVD                               # 48  fused [q | k] RoPE width
QKV_W = 2 * QKW + HD                         # 128 fused QKV-family width


# ---------------- in-kernel helpers ----------------
def _rmsnorm(x, w, true_dim, eps):
    # Padded feature lanes are exactly zero (zero-padded weight columns, even
    # after the bf16 cast), so sum(x*x)/true_dim == mean over the real d_model.
    ss = jnp.sum(x * x, axis=-1, keepdims=True) / true_dim
    return x * jax.lax.rsqrt(ss + eps) * w


# ---------------- fused Pallas kernel ----------------
def _llama_fused_kernel(x_ref, cs_ref, sn_ref, bias_ref, kmask_ref, emat_ref,
                        normw_ref, lmh_ref, ln_ref, wqkv_ref, wo_ref, wgu_ref,
                        wd_ref, out_ref, x_vmem,
                        *, n_heads, d_head, d_model, eps, n_layers):
    layer = pl.program_id(0)
    B, S, DPad = x_ref.shape
    BS = B * S
    hd = n_heads * d_head          # 32 query-head lanes
    qk_w = cs_ref.shape[1]         # 48 fused [q | k] RoPE width
    hs = n_heads * S               # 32 per-head score columns
    mp = wd_ref.shape[0]           # 128 padded d_mlp

    @pl.when(layer == 0)
    def _seed_residual():
        x_vmem[...] = x_ref[...].reshape(BS, DPad)

    x = x_vmem[...]                           # (BS, DP) f32 residual stream
    lnw = ln_ref[...]                         # (2, DP) ln1 / ln2
    # Shared tables loaded ONCE per grid step (no re-materialized broadcasts).
    cs = cs_ref[...]                          # (BS, 48) cos  [q*scale | k]
    sn = sn_ref[...]                          # (BS, 48) sin  [q*scale | k]
    bias = bias_ref[...]                      # (S, n_heads*S) causal 0 / -1e30
    kmask = kmask_ref[...]                    # (n_heads*S, hd) 0/1 head-block mask
    emat = emat_ref[...]                      # (kvd, hd) kv -> q-head duplication

    # ------------------------- self-attention -------------------------
    h1 = _rmsnorm(x, lnw[0:1, :], d_model, eps)
    # One lane-dense fused projection: [q | k | q@R | k@R | v_dup] = 128 lanes.
    qkv = jnp.dot(h1.astype(jnp.bfloat16), wqkv_ref[...],
                  preferred_element_type=jnp.float32)              # (BS, 128)
    # RoPE as a single 48-lane FMA (rotate_half folded into the weight, the
    # attention scale folded into the q lanes of cs/sn).
    qk = qkv[:, 0:qk_w] * cs + qkv[:, qk_w:2 * qk_w] * sn
    q = qk[:, 0:hd]                                                # (BS, 32)
    k_rot = qk[:, hd:qk_w]                                         # (BS, 16)
    v_dup = qkv[:, 2 * qk_w:]                                      # (BS, 32) kv values on q-head lanes

    # Duplicate rotated K onto its group's query-head lanes (GQA) - one tiny dot.
    k_dup = jnp.dot(k_rot, emat, preferred_element_type=jnp.float32)  # (BS, 32)

    # Batched attention with NO per-head loop / lane concats / transposes:
    # tile K/V n_heads times along the row axis and block-mask them, so one
    # einsum yields per-head score columns and a second einsum lands each
    # head's context back on its own output lanes.
    q3 = q.reshape(B, S, hd)
    k3 = k_dup.reshape(B, S, hd)
    v3 = v_dup.reshape(B, S, hd)
    kb = jnp.broadcast_to(k3[:, None], (B, n_heads, S, hd)).reshape(B, hs, hd)
    vb = jnp.broadcast_to(v3[:, None], (B, n_heads, S, hd)).reshape(B, hs, hd)
    kb = kb * kmask[None, :, :]
    vb = vb * kmask[None, :, :]

    scores = jnp.einsum('bqd,bkd->bqk', q3, kb,
                        preferred_element_type=jnp.float32)        # (B, S, n_heads*S)
    scores = scores + bias[None, :, :]
    # The row-global max is constant within every head segment, so per-head
    # softmax is exact (shift invariance).
    scores = scores - jnp.max(scores, axis=-1, keepdims=True)
    p = jnp.exp(scores)
    ctx = jnp.einsum('bqk,bkd->bqd', p, vb,
                     preferred_element_type=jnp.float32)           # (B, S, hd)
    # Per-head softmax denominators broadcast over d_head lanes by the same
    # 0/1 block matrix (one small matmul instead of a segmented reduce).
    denom = jnp.dot(p.reshape(BS, hs), kmask,
                    preferred_element_type=jnp.float32)            # (BS, hd)
    attn = ctx.reshape(BS, hd) * pl.reciprocal(denom, approx=False)

    x = x + jnp.dot(attn.astype(jnp.bfloat16), wo_ref[...],
                    preferred_element_type=jnp.float32)

    # --------------------------- gated MLP ----------------------------
    h2 = _rmsnorm(x, lnw[1:2, :], d_model, eps)
    gu = jnp.dot(h2.astype(jnp.bfloat16), wgu_ref[...],
                 preferred_element_type=jnp.float32)               # (BS, 2*MP)
    gate = gu[:, :mp]                                              # free 128-lane slice
    up = gu[:, mp:]
    act = gate * jax.nn.sigmoid(gate) * up                         # SiLU(gate) * up
    x = x + jnp.dot(act.astype(jnp.bfloat16), wd_ref[...],
                    preferred_element_type=jnp.float32)

    x_vmem[...] = x                       # residual stays resident in VMEM

    # ------- final RMSNorm + lm_head, fused into the last layer step -------
    @pl.when(layer == n_layers - 1)
    def _head():
        hf = _rmsnorm(x, normw_ref[...], d_model, eps)
        logits = jnp.dot(hf.astype(jnp.bfloat16), lmh_ref[...],
                         preferred_element_type=jnp.float32)       # (BS, VP)
        out_ref[...] = logits.reshape(B, S, out_ref.shape[-1])


# ---------------- host-side constant builders ----------------
def _rotate_half_matrix(d):
    half = d // 2
    m = jnp.zeros((d, d), jnp.float32)
    m = m.at[jnp.arange(half) + half, jnp.arange(half)].set(-1.0)
    m = m.at[jnp.arange(half), jnp.arange(half) + half].set(1.0)
    return m


def _gqa_expand_matrix():
    """(KVD, HD) 0/1 matrix duplicating each kv head onto its GROUP q-head lanes."""
    return jnp.kron(
        jnp.kron(jnp.eye(N_KV_HEADS, dtype=jnp.float32),
                 jnp.ones((1, GROUP), jnp.float32)),
        jnp.eye(D_HEAD, dtype=jnp.float32))


# ---------------- forward wrapper ----------------
@jax.jit
def llama_forward(tokens, packed):
    """tokens: (B, S) int32 -> (logits (B, S, VOCAB) f32, loss=None)."""
    B, S = tokens.shape
    BS = B * S

    # --- glue: embedding gather + rotary / mask tables (shared by all layers) ---
    x = jnp.take(packed['embed'], tokens, axis=0)                       # (B, S, DP)

    inv_freq = 1.0 / (ROPE_THETA ** (jnp.arange(0, D_HEAD, 2, dtype=jnp.float32) / D_HEAD))
    t = jnp.arange(S, dtype=jnp.float32)
    freqs = jnp.outer(t, inv_freq)
    emb = jnp.concatenate([freqs, freqs], axis=-1)                      # (S, d_head)
    cos, sin = jnp.cos(emb), jnp.sin(emb)
    scale = D_HEAD ** -0.5                                              # folded into q tables
    cs = jnp.concatenate([jnp.tile(cos, (1, N_HEADS)) * scale,
                          jnp.tile(cos, (1, N_KV_HEADS))], axis=-1)     # (S, QKW)
    sn = jnp.concatenate([jnp.tile(sin, (1, N_HEADS)) * scale,
                          jnp.tile(sin, (1, N_KV_HEADS))], axis=-1)
    cs = jnp.tile(cs, (B, 1))                                           # (BS, QKW)
    sn = jnp.tile(sn, (B, 1))

    causal = jnp.tril(jnp.ones((S, S), dtype=bool))
    bias = jnp.where(causal, 0.0, -1e30).astype(jnp.float32)            # finite mask (f32 only)
    bias_h = jnp.tile(bias, (1, N_HEADS))                               # (S, N_HEADS*S)
    kmask = jnp.kron(jnp.eye(N_HEADS, dtype=jnp.float32),
                     jnp.ones((S, D_HEAD), jnp.float32))                # (N_HEADS*S, HD)
    emat = _gqa_expand_matrix()                                         # (KVD, HD)

    kernel = functools.partial(
        _llama_fused_kernel, n_heads=N_HEADS, d_head=D_HEAD,
        d_model=D_MODEL, eps=RMS_EPS, n_layers=N_LAYERS)

    def resident(shape):                     # same block every grid step
        zeros = (0,) * len(shape)
        return pl.BlockSpec(shape, lambda l, _z=zeros: _z)

    def per_layer(shape):                    # streams (double-buffers) block `l`
        zeros = (0,) * len(shape)
        return pl.BlockSpec((None,) + tuple(shape), lambda l, _z=zeros: (l,) + _z)

    logits_pad = pl.pallas_call(
        kernel,
        out_shape=jax.ShapeDtypeStruct((B, S, VP), jnp.float32),
        grid=(N_LAYERS,),
        in_specs=[
            resident((B, S, DP)),            # embedded tokens (seed residual)
            resident((BS, QKW)),             # cos table [q*scale | k]
            resident((BS, QKW)),             # sin table [q*scale | k]
            resident((S, N_HEADS * S)),      # causal bias tiled per head
            resident((N_HEADS * S, HD)),     # 0/1 head-block mask (+softmax-denom matrix)
            resident((KVD, HD)),             # GQA kv -> q-head duplication matrix
            resident((1, DP)),               # final RMSNorm weight
            resident((DP, VP)),              # lm_head (bf16)
            per_layer((2, DP)),              # ln1 / ln2
            per_layer((DP, QKV_W)),          # fused [Wq|Wk|WqR|WkR|WvE] (bf16)
            per_layer((HD, DP)),             # Wo (bf16)
            per_layer((DP, 2 * MP)),         # fused [Wgate|Wup] (bf16)
            per_layer((MP, DP)),             # Wdown (bf16)
        ],
        out_specs=resident((B, S, VP)),
        scratch_shapes=[pltpu.VMEM((BS, DP), jnp.float32)],  # resident residual
        compiler_params=pltpu.CompilerParams(
            dimension_semantics=("arbitrary",),
            # Explicit VMEM budget (toy config uses <1 MiB); re-derive for the
            # v7x 64 MiB part when scaling up.
            vmem_limit_bytes=32 * 1024 * 1024),
    )(x, cs, sn, bias_h, kmask, emat, packed['norm'], packed['lm_head'],
      packed['ln'], packed['wqkv'], packed['wo'], packed['wgu'], packed['wd'])

    logits = logits_pad[:, :, :VOCAB]
    # TODO(synk): cross-entropy loss path (y is not None) not implemented in-kernel.
    return logits, None


# ---------------- parameter init (PyTorch layout) + packing ----------------
def init_params(key):
    def normal(k, shape):
        return INIT_STD * jax.random.normal(k, shape, dtype=jnp.float32)

    keys = jax.random.split(key, 2 + N_LAYERS)
    params = {
        'embed': normal(keys[0], (VOCAB, D_MODEL)),
        'lm_head': normal(keys[1], (VOCAB, D_MODEL)),
        'norm': jnp.ones((D_MODEL,), jnp.float32),      # RMSNorm weight (ones)
        'layers': [],
    }
    for i in range(N_LAYERS):
        lk = jax.random.split(keys[2 + i], 7)
        params['layers'].append({
            'ln1': jnp.ones((D_MODEL,), jnp.float32),
            'ln2': jnp.ones((D_MODEL,), jnp.float32),
            'wq': normal(lk[0], (N_HEADS * D_HEAD, D_MODEL)),
            'wk': normal(lk[1], (N_KV_HEADS * D_HEAD, D_MODEL)),
            'wv': normal(lk[2], (N_KV_HEADS * D_HEAD, D_MODEL)),
            'wo': normal(lk[3], (D_MODEL, D_MODEL)),
            'wgate': normal(lk[4], (D_MLP, D_MODEL)),
            'wup': normal(lk[5], (D_MLP, D_MODEL)),
            'wdown': normal(lk[6], (D_MODEL, D_MLP)),
        })
    return params


def pack_params(params):
    """PyTorch (out,in) weights -> transposed, zero-padded, fused, layer-stacked,
    bf16-streamed layout (rotate_half and GQA duplication folded in)."""
    r_q = jnp.kron(jnp.eye(N_HEADS, dtype=jnp.float32), _rotate_half_matrix(D_HEAD))
    r_k = jnp.kron(jnp.eye(N_KV_HEADS, dtype=jnp.float32), _rotate_half_matrix(D_HEAD))
    emat = _gqa_expand_matrix()

    def pad_in(w):                       # pad the contraction (input) dim to DP
        return jnp.pad(w, ((0, DP - w.shape[0]), (0, 0)))

    ln, wqkv, wo, wgu, wd = [], [], [], [], []
    for lp in params['layers']:
        ln.append(jnp.stack([jnp.pad(lp['ln1'], (0, DP - D_MODEL)),
                             jnp.pad(lp['ln2'], (0, DP - D_MODEL))]))        # (2, DP)
        wq_t = pad_in(lp['wq'].T)                                            # (DP, HD)
        wk_t = pad_in(lp['wk'].T)                                            # (DP, KVD)
        wv_t = pad_in(lp['wv'].T)                                            # (DP, KVD)
        wqkv.append(jnp.concatenate(
            [wq_t, wk_t, wq_t @ r_q, wk_t @ r_k, wv_t @ emat], axis=1))      # (DP, 128)
        wo.append(jnp.pad(lp['wo'].T, ((0, 0), (0, DP - D_MODEL))))          # (HD, DP)
        wgu.append(jnp.concatenate(
            [jnp.pad(lp['wgate'].T, ((0, DP - D_MODEL), (0, MP - D_MLP))),
             jnp.pad(lp['wup'].T, ((0, DP - D_MODEL), (0, MP - D_MLP)))],
            axis=1))                                                         # (DP, 2*MP)
        wd.append(jnp.pad(lp['wdown'].T, ((0, MP - D_MLP), (0, DP - D_MODEL))))  # (MP, DP)

    bf16 = jnp.bfloat16
    return {
        'embed': jnp.pad(params['embed'], ((0, 0), (0, DP - D_MODEL))),        # f32
        'norm': jnp.pad(params['norm'], (0, DP - D_MODEL)).reshape(1, DP),     # f32
        'lm_head': jnp.pad(params['lm_head'].T,
                           ((0, DP - D_MODEL), (0, VP - VOCAB))).astype(bf16),
        'ln': jnp.stack(ln),                                                   # f32 (tiny)
        'wqkv': jnp.stack(wqkv).astype(bf16),
        'wo': jnp.stack(wo).astype(bf16),
        'wgu': jnp.stack(wgu).astype(bf16),
        'wd': jnp.stack(wd).astype(bf16),
    }


if __name__ == "__main__":
    key = jax.random.PRNGKey(0)
    pkey, tkey = jax.random.split(key)
    params = init_params(pkey)
    packed = pack_params(params)
    tokens = jax.random.randint(tkey, (2, 8), 0, VOCAB, dtype=jnp.int32)

    logits, loss = llama_forward(tokens, packed)
    jax.block_until_ready(logits)

    assert logits.shape == (2, 8, VOCAB) and logits.dtype == jnp.float32
    assert bool(jnp.all(jnp.isfinite(logits)))
    print("KERNEL_OK")
</pallas_src>

<mosaic_0001>
module attributes {stable_mosaic.version = 11 : i64} {
  func.func @_llama_fused_kernel(%arg0: i32, %arg1: memref<2x8x128xf32, #tpu.memory_space<vmem>>, %arg2: memref<16x48xf32, #tpu.memory_space<vmem>>, %arg3: memref<16x48xf32, #tpu.memory_space<vmem>>, %arg4: memref<8x32xf32, #tpu.memory_space<vmem>>, %arg5: memref<32x32xf32, #tpu.memory_space<vmem>>, %arg6: memref<16x32xf32, #tpu.memory_space<vmem>>, %arg7: memref<1x128xf32, #tpu.memory_space<vmem>>, %arg8: memref<128x128xbf16, #tpu.memory_space<vmem>>, %arg9: memref<1x2x128xf32, #tpu.memory_space<vmem>>, %arg10: memref<1x128x128xbf16, #tpu.memory_space<vmem>>, %arg11: memref<1x32x128xbf16, #tpu.memory_space<vmem>>, %arg12: memref<1x128x256xbf16, #tpu.memory_space<vmem>>, %arg13: memref<1x128x128xbf16, #tpu.memory_space<vmem>>, %arg14: memref<2x8x128xf32, #tpu.memory_space<vmem>>, %arg15: memref<16x128xf32, #tpu.memory_space<vmem>>) attributes {dimension_semantics = [#tpu.dimension_semantics<arbitrary>], iteration_bounds = array<i64: 2>, scalar_prefetch = 0 : i64, scratch_operands = 1 : i64, tpu.core_type = #tpu.core_type<tc>, window_params = [{pipeline_mode = #tpu.pipeline_mode<synchronous>, transform_indices = @transform_0, window_bounds = array<i64: 2, 8, 128>}, {pipeline_mode = #tpu.pipeline_mode<synchronous>, transform_indices = @transform_1, window_bounds = array<i64: 16, 48>}, {pipeline_mode = #tpu.pipeline_mode<synchronous>, transform_indices = @transform_2, window_bounds = array<i64: 16, 48>}, {pipeline_mode = #tpu.pipeline_mode<synchronous>, transform_indices = @transform_3, window_bounds = array<i64: 8, 32>}, {pipeline_mode = #tpu.pipeline_mode<synchronous>, transform_indices = @transform_4, window_bounds = array<i64: 32, 32>}, {pipeline_mode = #tpu.pipeline_mode<synchronous>, transform_indices = @transform_5, window_bounds = array<i64: 16, 32>}, {pipeline_mode = #tpu.pipeline_mode<synchronous>, transform_indices = @transform_6, window_bounds = array<i64: 1, 128>}, {pipeline_mode = #tpu.pipeline_mode<synchronous>, transform_indices = @transform_7, window_bounds = array<i64: 128, 128>}, {transform_indices = @transform_8, window_bounds = array<i64: 1, 2, 128>}, {transform_indices = @transform_9, window_bounds = array<i64: 1, 128, 128>}, {transform_indices = @transform_10, window_bounds = array<i64: 1, 32, 128>}, {transform_indices = @transform_11, window_bounds = array<i64: 1, 128, 256>}, {transform_indices = @transform_12, window_bounds = array<i64: 1, 128, 128>}, {pipeline_mode = #tpu.pipeline_mode<synchronous>, transform_indices = @transform_13, window_bounds = array<i64: 2, 8, 128>}]} {
    %c0_i32 = arith.constant 0 : i32
    %0 = arith.cmpi eq, %arg0, %c0_i32 : i32
    %1 = arith.extui %0 : i1 to i32
    %c0_i32_0 = arith.constant 0 : i32
    %2 = arith.cmpi ne, %1, %c0_i32_0 : i32
    scf.if %2 {
      %c0_45 = arith.constant 0 : index
      %c0_46 = arith.constant 0 : index
      %c0_47 = arith.constant 0 : index
      %109 = vector.load %arg1[%c0_45, %c0_46, %c0_47] : memref<2x8x128xf32, #tpu.memory_space<vmem>>, vector<2x8x128xf32>
      %110 = vector.shape_cast %109 : vector<2x8x128xf32> to vector<16x128xf32>
      %c0_48 = arith.constant 0 : index
      %c0_49 = arith.constant 0 : index
      %111 = vector.load %arg15[%c0_48, %c0_49] : memref<16x128xf32, #tpu.memory_space<vmem>>, vector<16x128xf32>
      tpu.vector_store %arg15[%c0_48, %c0_49], %110 {strides = array<i32>} : memref<16x128xf32, #tpu.memory_space<vmem>>, vector<16x128xf32>,
    } else {
    }
    %c0 = arith.constant 0 : index
    %c0_1 = arith.constant 0 : index
    %3 = vector.load %arg15[%c0, %c0_1] : memref<16x128xf32, #tpu.memory_space<vmem>>, vector<16x128xf32>
    %c0_2 = arith.constant 0 : index
    %c0_3 = arith.constant 0 : index
    %c0_4 = arith.constant 0 : index
    %4 = vector.load %arg9[%c0_2, %c0_3, %c0_4] : memref<1x2x128xf32, #tpu.memory_space<vmem>>, vector<1x2x128xf32>
    %5 = vector.shape_cast %4 : vector<1x2x128xf32> to vector<2x128xf32>
    %c0_5 = arith.constant 0 : index
    %c0_6 = arith.constant 0 : index
    %6 = vector.load %arg2[%c0_5, %c0_6] : memref<16x48xf32, #tpu.memory_space<vmem>>, vector<16x48xf32>
    %c0_7 = arith.constant 0 : index
    %c0_8 = arith.constant 0 : index
    %7 = vector.load %arg3[%c0_7, %c0_8] : memref<16x48xf32, #tpu.memory_space<vmem>>, vector<16x48xf32>
    %c0_9 = arith.constant 0 : index
    %c0_10 = arith.constant 0 : index
    %8 = vector.load %arg4[%c0_9, %c0_10] : memref<8x32xf32, #tpu.memory_space<vmem>>, vector<8x32xf32>
    %c0_11 = arith.constant 0 : index
    %c0_12 = arith.constant 0 : index
    %9 = vector.load %arg5[%c0_11, %c0_12] : memref<32x32xf32, #tpu.memory_space<vmem>>, vector<32x32xf32>
    %c0_13 = arith.constant 0 : index
    %c0_14 = arith.constant 0 : index
    %10 = vector.load %arg6[%c0_13, %c0_14] : memref<16x32xf32, #tpu.memory_space<vmem>>, vector<16x32xf32>
    %11 = vector.extract_strided_slice %5 {offsets = [0, 0], sizes = [1, 128], strides = [1, 1]} : vector<2x128xf32> to vector<1x128xf32>
    %12 = arith.mulf %3, %3 : vector<16x128xf32>
    %cst = arith.constant dense<0.000000e+00> : vector<16xf32>
    %13 = vector.multi_reduction <add>, %12, %cst [1] : vector<16x128xf32> to vector<16xf32>
    %14 = vector.shape_cast %13 : vector<16xf32> to vector<16x1xf32>
    %cst_15 = arith.constant 3.200000e+01 : f32
    %15 = vector.broadcast %cst_15 : f32 to vector<16x1xf32>
    %16 = arith.divf %14, %15 : vector<16x1xf32>
    %cst_16 = arith.constant 9.99999997E-7 : f32
    %17 = vector.broadcast %cst_16 : f32 to vector<16x1xf32>
    %18 = arith.addf %16, %17 : vector<16x1xf32>
    %19 = math.rsqrt %18 : vector<16x1xf32>
    %20 = vector.broadcast %19 : vector<16x1xf32> to vector<16x128xf32>
    %21 = arith.mulf %3, %20 : vector<16x128xf32>
    %22 = vector.broadcast %11 : vector<1x128xf32> to vector<16x128xf32>
    %23 = arith.mulf %21, %22 : vector<16x128xf32>
    %24 = arith.truncf %23 : vector<16x128xf32> to vector<16x128xbf16>
    %c0_17 = arith.constant 0 : index
    %c0_18 = arith.constant 0 : index
    %c0_19 = arith.constant 0 : index
    %25 = vector.load %arg10[%c0_17, %c0_18, %c0_19] : memref<1x128x128xbf16, #tpu.memory_space<vmem>>, vector<1x128x128xbf16>
    %26 = vector.shape_cast %25 : vector<1x128x128xbf16> to vector<128x128xbf16>
    %cst_20 = arith.constant dense<0.000000e+00> : vector<16x128xf32>
    %27 = tpu.matmul %24, %26, %cst_20 {dimension_numbers = #tpu.dot_dimension_numbers<[1], [0], [0], [1], [0, 0, 1, 1], [], []>} : vector<16x128xbf16>, vector<128x128xbf16>, vector<16x128xf32> -> vector<16x128xf32>
    %28 = vector.extract_strided_slice %27 {offsets = [0, 0], sizes = [16, 48], strides = [1, 1]} : vector<16x128xf32> to vector<16x48xf32>
    %29 = arith.mulf %28, %6 : vector<16x48xf32>
    %30 = vector.extract_strided_slice %27 {offsets = [0, 48], sizes = [16, 48], strides = [1, 1]} : vector<16x128xf32> to vector<16x48xf32>
    %31 = arith.mulf %30, %7 : vector<16x48xf32>
    %32 = arith.addf %29, %31 : vector<16x48xf32>
    %33 = vector.extract_strided_slice %32 {offsets = [0, 0], sizes = [16, 32], strides = [1, 1]} : vector<16x48xf32> to vector<16x32xf32>
    %34 = vector.extract_strided_slice %32 {offsets = [0, 32], sizes = [16, 16], strides = [1, 1]} : vector<16x48xf32> to vector<16x16xf32>
    %35 = vector.extract_strided_slice %27 {offsets = [0, 96], sizes = [16, 32], strides = [1, 1]} : vector<16x128xf32> to vector<16x32xf32>
    %cst_21 = arith.constant dense<0.000000e+00> : vector<16x32xf32>
    %36 = tpu.matmul %34, %10, %cst_21 {dimension_numbers = #tpu.dot_dimension_numbers<[1], [0], [0], [1], [0, 0, 1, 1], [], []>} : vector<16x16xf32>, vector<16x32xf32>, vector<16x32xf32> -> vector<16x32xf32>
    %37 = vector.shape_cast %33 : vector<16x32xf32> to vector<2x8x32xf32>
    %38 = vector.shape_cast %36 : vector<16x32xf32> to vector<2x8x32xf32>
    %39 = vector.shape_cast %35 : vector<16x32xf32> to vector<2x8x32xf32>
    %40 = vector.shape_cast %38 : vector<2x8x32xf32> to vector<2x1x8x32xf32>
    %41 = vector.shape_cast %40 : vector<2x1x8x32xf32> to vector<2x1x8x32xf32>
    %42 = vector.broadcast %41 : vector<2x1x8x32xf32> to vector<2x4x8x32xf32>
    %43 = vector.shape_cast %42 : vector<2x4x8x32xf32> to vector<2x32x32xf32>
    %44 = vector.shape_cast %39 : vector<2x8x32xf32> to vector<2x1x8x32xf32>
    %45 = vector.shape_cast %44 : vector<2x1x8x32xf32> to vector<2x1x8x32xf32>
    %46 = vector.broadcast %45 : vector<2x1x8x32xf32> to vector<2x4x8x32xf32>
    %47 = vector.shape_cast %46 : vector<2x4x8x32xf32> to vector<2x32x32xf32>
    %48 = vector.shape_cast %9 : vector<32x32xf32> to vector<1x32x32xf32>
    %49 = vector.broadcast %48 : vector<1x32x32xf32> to vector<2x32x32xf32>
    %50 = arith.mulf %43, %49 : vector<2x32x32xf32>
    %51 = vector.shape_cast %9 : vector<32x32xf32> to vector<1x32x32xf32>
    %52 = vector.broadcast %51 : vector<1x32x32xf32> to vector<2x32x32xf32>
    %53 = arith.mulf %47, %52 : vector<2x32x32xf32>
    "tpu.trace_start"() <{level = 10 : i32, message = "bqd,bkd->bqk"}> : () -> ()
    %cst_22 = arith.constant dense<0.000000e+00> : vector<2x8x32xf32>
    %54 = tpu.matmul %37, %50, %cst_22 {dimension_numbers = #tpu.dot_dimension_numbers<[2], [2], [1], [1], [0, 0, 0, 1, 1, 1], [0], [0]>} : vector<2x8x32xf32>, vector<2x32x32xf32>, vector<2x8x32xf32> -> vector<2x8x32xf32>
    "tpu.trace_stop"() : () -> ()
    %55 = vector.shape_cast %8 : vector<8x32xf32> to vector<1x8x32xf32>
    %56 = vector.broadcast %55 : vector<1x8x32xf32> to vector<2x8x32xf32>
    %57 = arith.addf %54, %56 : vector<2x8x32xf32>
    %cst_23 = arith.constant dense<0xFF800000> : vector<2x8xf32>
    %58 = vector.multi_reduction <maximumf>, %57, %cst_23 [2] : vector<2x8x32xf32> to vector<2x8xf32>
    %59 = vector.shape_cast %58 : vector<2x8xf32> to vector<2x8x1xf32>
    %60 = vector.broadcast %59 : vector<2x8x1xf32> to vector<2x8x32xf32>
    %61 = arith.subf %57, %60 : vector<2x8x32xf32>
    %62 = math.exp %61 : vector<2x8x32xf32>
    "tpu.trace_start"() <{level = 10 : i32, message = "bqk,bkd->bqd"}> : () -> ()
    %cst_24 = arith.constant dense<0.000000e+00> : vector<2x8x32xf32>
    %63 = tpu.matmul %62, %53, %cst_24 {dimension_numbers = #tpu.dot_dimension_numbers<[2], [1], [1], [2], [0, 0, 0, 1, 1, 2], [0], [0]>} : vector<2x8x32xf32>, vector<2x32x32xf32>, vector<2x8x32xf32> -> vector<2x8x32xf32>
    "tpu.trace_stop"() : () -> ()
    %64 = vector.shape_cast %62 : vector<2x8x32xf32> to vector<16x32xf32>
    %cst_25 = arith.constant dense<0.000000e+00> : vector<16x32xf32>
    %65 = tpu.matmul %64, %9, %cst_25 {dimension_numbers = #tpu.dot_dimension_numbers<[1], [0], [0], [1], [0, 0, 1, 1], [], []>} : vector<16x32xf32>, vector<32x32xf32>, vector<16x32xf32> -> vector<16x32xf32>
    %66 = vector.shape_cast %63 : vector<2x8x32xf32> to vector<16x32xf32>
    %67 = tpu.reciprocal %65 : vector<16x32xf32> -> vector<16x32xf32>
    %68 = arith.mulf %66, %67 : vector<16x32xf32>
    %69 = arith.truncf %68 : vector<16x32xf32> to vector<16x32xbf16>
    %c0_26 = arith.constant 0 : index
    %c0_27 = arith.constant 0 : index
    %c0_28 = arith.constant 0 : index
    %70 = vector.load %arg11[%c0_26, %c0_27, %c0_28] : memref<1x32x128xbf16, #tpu.memory_space<vmem>>, vector<1x32x128xbf16>
    %71 = vector.shape_cast %70 : vector<1x32x128xbf16> to vector<32x128xbf16>
    %cst_29 = arith.constant dense<0.000000e+00> : vector<16x128xf32>
    %72 = tpu.matmul %69, %71, %cst_29 {dimension_numbers = #tpu.dot_dimension_numbers<[1], [0], [0], [1], [0, 0, 1, 1], [], []>} : vector<16x32xbf16>, vector<32x128xbf16>, vector<16x128xf32> -> vector<16x128xf32>
    %73 = arith.addf %3, %72 : vector<16x128xf32>
    %74 = vector.extract_strided_slice %5 {offsets = [1, 0], sizes = [1, 128], strides = [1, 1]} : vector<2x128xf32> to vector<1x128xf32>
    %75 = arith.mulf %73, %73 : vector<16x128xf32>
    %cst_30 = arith.constant dense<0.000000e+00> : vector<16xf32>
    %76 = vector.multi_reduction <add>, %75, %cst_30 [1] : vector<16x128xf32> to vector<16xf32>
    %77 = vector.shape_cast %76 : vector<16xf32> to vector<16x1xf32>
    %cst_31 = arith.constant 3.200000e+01 : f32
    %78 = vector.broadcast %cst_31 : f32 to vector<16x1xf32>
    %79 = arith.divf %77, %78 : vector<16x1xf32>
    %cst_32 = arith.constant 9.99999997E-7 : f32
    %80 = vector.broadcast %cst_32 : f32 to vector<16x1xf32>
    %81 = arith.addf %79, %80 : vector<16x1xf32>
    %82 = math.rsqrt %81 : vector<16x1xf32>
    %83 = vector.broadcast %82 : vector<16x1xf32> to vector<16x128xf32>
    %84 = arith.mulf %73, %83 : vector<16x128xf32>
    %85 = vector.broadcast %74 : vector<1x128xf32> to vector<16x128xf32>
    %86 = arith.mulf %84, %85 : vector<16x128xf32>
    %87 = arith.truncf %86 : vector<16x128xf32> to vector<16x128xbf16>
    %c0_33 = arith.constant 0 : index
    %c0_34 = arith.constant 0 : index
    %c0_35 = arith.constant 0 : index
    %88 = vector.load %arg12[%c0_33, %c0_34, %c0_35] : memref<1x128x256xbf16, #tpu.memory_space<vmem>>, vector<1x128x256xbf16>
    %89 = vector.shape_cast %88 : vector<1x128x256xbf16> to vector<128x256xbf16>
    %cst_36 = arith.constant dense<0.000000e+00> : vector<16x256xf32>
    %90 = tpu.matmul %87, %89, %cst_36 {dimension_numbers = #tpu.dot_dimension_numbers<[1], [0], [0], [1], [0, 0, 1, 1], [], []>} : vector<16x128xbf16>, vector<128x256xbf16>, vector<16x256xf32> -> vector<16x256xf32>
    %91 = vector.extract_strided_slice %90 {offsets = [0, 0], sizes = [16, 128], strides = [1, 1]} : vector<16x256xf32> to vector<16x128xf32>
    %92 = vector.extract_strided_slice %90 {offsets = [0, 128], sizes = [16, 128], strides = [1, 1]} : vector<16x256xf32> to vector<16x128xf32>
    %93 = arith.negf %91 : vector<16x128xf32>
    %94 = math.exp %93 : vector<16x128xf32>
    %cst_37 = arith.constant 1.000000e+00 : f32
    %95 = vector.broadcast %cst_37 : f32 to vector<16x128xf32>
    %96 = arith.addf %95, %94 : vector<16x128xf32>
    %97 = arith.divf %95, %96 : vector<16x128xf32>
    %98 = arith.mulf %91, %97 : vector<16x128xf32>
    %99 = arith.mulf %98, %92 : vector<16x128xf32>
    %100 = arith.truncf %99 : vector<16x128xf32> to vector<16x128xbf16>
    %c0_38 = arith.constant 0 : index
    %c0_39 = arith.constant 0 : index
    %c0_40 = arith.constant 0 : index
    %101 = vector.load %arg13[%c0_38, %c0_39, %c0_40] : memref<1x128x128xbf16, #tpu.memory_space<vmem>>, vector<1x128x128xbf16>
    %102 = vector.shape_cast %101 : vector<1x128x128xbf16> to vector<128x128xbf16>
    %cst_41 = arith.constant dense<0.000000e+00> : vector<16x128xf32>
    %103 = tpu.matmul %100, %102, %cst_41 {dimension_numbers = #tpu.dot_dimension_numbers<[1], [0], [0], [1], [0, 0, 1, 1], [], []>} : vector<16x128xbf16>, vector<128x128xbf16>, vector<16x128xf32> -> vector<16x128xf32>
    %104 = arith.addf %73, %103 : vector<16x128xf32>
    %c0_42 = arith.constant 0 : index
    %c0_43 = arith.constant 0 : index
    %105 = vector.load %arg15[%c0_42, %c0_43] : memref<16x128xf32, #tpu.memory_space<vmem>>, vector<16x128xf32>
    tpu.vector_store %arg15[%c0_42, %c0_43], %104 {strides = array<i32>} : memref<16x128xf32, #tpu.memory_space<vmem>>, vector<16x128xf32>,
    %c1_i32 = arith.constant 1 : i32
    %106 = arith.cmpi eq, %arg0, %c1_i32 : i32
    %107 = arith.extui %106 : i1 to i32
    %c0_i32_44 = arith.constant 0 : i32
    %108 = arith.cmpi ne, %107, %c0_i32_44 : i32
    scf.if %108 {
      %c0_45 = arith.constant 0 : index
      %c0_46 = arith.constant 0 : index
      %109 = vector.load %arg7[%c0_45, %c0_46] : memref<1x128xf32, #tpu.memory_space<vmem>>, vector<1x128xf32>
      %110 = arith.mulf %104, %104 : vector<16x128xf32>
      %cst_47 = arith.constant dense<0.000000e+00> : vector<16xf32>
      %111 = vector.multi_reduction <add>, %110, %cst_47 [1] : vector<16x128xf32> to vector<16xf32>
      %112 = vector.shape_cast %111 : vector<16xf32> to vector<16x1xf32>
      %cst_48 = arith.constant 3.200000e+01 : f32
      %113 = vector.broadcast %cst_48 : f32 to vector<16x1xf32>
      %114 = arith.divf %112, %113 : vector<16x1xf32>
      %cst_49 = arith.constant 9.99999997E-7 : f32
      %115 = vector.broadcast %cst_49 : f32 to vector<16x1xf32>
      %116 = arith.addf %114, %115 : vector<16x1xf32>
      %117 = math.rsqrt %116 : vector<16x1xf32>
      %118 = vector.broadcast %117 : vector<16x1xf32> to vector<16x128xf32>
      %119 = arith.mulf %104, %118 : vector<16x128xf32>
      %120 = vector.broadcast %109 : vector<1x128xf32> to vector<16x128xf32>
      %121 = arith.mulf %119, %120 : vector<16x128xf32>
      %122 = arith.truncf %121 : vector<16x128xf32> to vector<16x128xbf16>
      %c0_50 = arith.constant 0 : index
      %c0_51 = arith.constant 0 : index
      %123 = vector.load %arg8[%c0_50, %c0_51] : memref<128x128xbf16, #tpu.memory_space<vmem>>, vector<128x128xbf16>
      %cst_52 = arith.constant dense<0.000000e+00> : vector<16x128xf32>
      %124 = tpu.matmul %122, %123, %cst_52 {dimension_numbers = #tpu.dot_dimension_numbers<[1], [0], [0], [1], [0, 0, 1, 1], [], []>} : vector<16x128xbf16>, vector<128x128xbf16>, vector<16x128xf32> -> vector<16x128xf32>
      %125 = vector.shape_cast %124 : vector<16x128xf32> to vector<2x8x128xf32>
      %c0_53 = arith.constant 0 : index
      %c0_54 = arith.constant 0 : index
      %c0_55 = arith.constant 0 : index
      %126 = vector.load %arg14[%c0_53, %c0_54, %c0_55] : memref<2x8x128xf32, #tpu.memory_space<vmem>>, vector<2x8x128xf32>
      tpu.vector_store %arg14[%c0_53, %c0_54, %c0_55], %125 {strides = array<i32>} : memref<2x8x128xf32, #tpu.memory_space<vmem>>, vector<2x8x128xf32>,
    } else {
    }
    return
  }
  func.func @transform_0(%arg0: i32) -> (i32, i32, i32) {
    %c0_i32 = arith.constant 0 : i32
    %c0_i32_0 = arith.constant 0 : i32
    %c0_i32_1 = arith.constant 0 : i32
    %c0_i32_2 = arith.constant 0 : i32
    return %c0_i32, %c0_i32_0, %c0_i32_1 : i32, i32, i32
  }
  func.func @transform_1(%arg0: i32) -> (i32, i32) {
    %c0_i32 = arith.constant 0 : i32
    %c0_i32_0 = arith.constant 0 : i32
    %c0_i32_1 = arith.constant 0 : i32
    return %c0_i32, %c0_i32_0 : i32, i32
  }
  func.func @transform_2(%arg0: i32) -> (i32, i32) {
    %c0_i32 = arith.constant 0 : i32
    %c0_i32_0 = arith.constant 0 : i32
    %c0_i32_1 = arith.constant 0 : i32
    return %c0_i32, %c0_i32_0 : i32, i32
  }
  func.func @transform_3(%arg0: i32) -> (i32, i32) {
    %c0_i32 = arith.constant 0 : i32
    %c0_i32_0 = arith.constant 0 : i32
    %c0_i32_1 = arith.constant 0 : i32
    return %c0_i32, %c0_i32_0 : i32, i32
  }
  func.func @transform_4(%arg0: i32) -> (i32, i32) {
    %c0_i32 = arith.constant 0 : i32
    %c0_i32_0 = arith.constant 0 : i32
    %c0_i32_1 = arith.constant 0 : i32
    return %c0_i32, %c0_i32_0 : i32, i32
  }
  func.func @transform_5(%arg0: i32) -> (i32, i32) {
    %c0_i32 = arith.constant 0 : i32
    %c0_i32_0 = arith.constant 0 : i32
    %c0_i32_1 = arith.constant 0 : i32
    return %c0_i32, %c0_i32_0 : i32, i32
  }
  func.func @transform_6(%arg0: i32) -> (i32, i32) {
    %c0_i32 = arith.constant 0 : i32
    %c0_i32_0 = arith.constant 0 : i32
    %c0_i32_1 = arith.constant 0 : i32
    return %c0_i32, %c0_i32_0 : i32, i32
  }
  func.func @transform_7(%arg0: i32) -> (i32, i32) {
    %c0_i32 = arith.constant 0 : i32
    %c0_i32_0 = arith.constant 0 : i32
    %c0_i32_1 = arith.constant 0 : i32
    return %c0_i32, %c0_i32_0 : i32, i32
  }
  func.func @transform_8(%arg0: i32) -> (i32, i32, i32) {
    %c0_i32 = arith.constant 0 : i32
    %c0_i32_0 = arith.constant 0 : i32
    %c0_i32_1 = arith.constant 0 : i32
    return %arg0, %c0_i32, %c0_i32_0 : i32, i32, i32
  }
  func.func @transform_9(%arg0: i32) -> (i32, i32, i32) {
    %c0_i32 = arith.constant 0 : i32
    %c0_i32_0 = arith.constant 0 : i32
    %c0_i32_1 = arith.constant 0 : i32
    return %arg0, %c0_i32, %c0_i32_0 : i32, i32, i32
  }
  func.func @transform_10(%arg0: i32) -> (i32, i32, i32) {
    %c0_i32 = arith.constant 0 : i32
    %c0_i32_0 = arith.constant 0 : i32
    %c0_i32_1 = arith.constant 0 : i32
    return %arg0, %c0_i32, %c0_i32_0 : i32, i32, i32
  }
  func.func @transform_11(%arg0: i32) -> (i32, i32, i32) {
    %c0_i32 = arith.constant 0 : i32
    %c0_i32_0 = arith.constant 0 : i32
    %c0_i32_1 = arith.constant 0 : i32
    return %arg0, %c0_i32, %c0_i32_0 : i32, i32, i32
  }
  func.func @transform_12(%arg0: i32) -> (i32, i32, i32) {
    %c0_i32 = arith.constant 0 : i32
    %c0_i32_0 = arith.constant 0 : i32
    %c0_i32_1 = arith.constant 0 : i32
    return %arg0, %c0_i32, %c0_i32_0 : i32, i32, i32
  }
  func.func @transform_13(%arg0: i32) -> (i32, i32, i32) {
    %c0_i32 = arith.constant 0 : i32
    %c0_i32_0 = arith.constant 0 : i32
    %c0_i32_1 = arith.constant 0 : i32
    %c0_i32_2 = arith.constant 0 : i32
    return %c0_i32, %c0_i32_0, %c0_i32_1 : i32, i32, i32
  }
}

</mosaic_0001>

<bundles_post_ra>
// kernel: tile.44
= control target key start
LH: loop header
LB: loop body
LE: loop exit
PB: predicated region body
PF: predicated region fallthrough
CT: control target
= control target key end

     0   :  { %vm43_vm0 = vcmask 1047556   ;;  %vm45_vm1 = vcmask 64512   ;;  %vm55_vm2 = vcmask 130112   ;;  %s112_s0 = inlined_call_operand.vmem [shape: f32[8,2,8], index: 0, kind: input, shape index: {}]   ;;  %s113_s1 = inlined_call_operand.vmem [shape: f32[8,16], index: 1, kind: output, shape index: {}]  }
   0x1   :  { %v63_v0 = vld [vmem:[%s112_s0 + $0xe] sm:$0x3]  ;;  %v64_v1 = vld [vmem:[%s112_s0 + $0xc] sm:$0x3]  ;;  %v65_v2 = vld [vmem:[%s112_s0 + $0xa] sm:$0x3] }
   0x2   :  { %9 = vst [vmem:[#allocation0 + $0x38] sm:$0x3] %v63_v0  ;;  %14 = vst [vmem:[#allocation0 + $0x30] sm:$0x3] %v64_v1  ;;  %v66_v3 = vld [vmem:[%s112_s0 + $0x8] sm:$0x3] }
   0x3   :  { %19 = vst [vmem:[#allocation0 + $0x28] sm:$0x3] %v65_v2  ;;  %v67_v4 = vld [vmem:[%s112_s0 + $0x6] sm:$0x3]  ;;  %v68_v5 = vld [vmem:[%s112_s0 + $0x4] sm:$0x3] }
   0x4   :  { %24 = vst [vmem:[#allocation0 + $0x20] sm:$0x3] %v66_v3  ;;  %29 = vst [vmem:[#allocation0 + $0x18] sm:$0x3] %v67_v4  ;;  %v69_v6 = vld [vmem:[%s112_s0 + $0x2] sm:$0x3] }
   0x5   :  { %34 = vst [vmem:[#allocation0 + $0x10] sm:$0x3] %v68_v5  ;;  %v39_v7 = vld [vmem:[%s112_s0] sm:$0x3]  ;;  %38 = vst [vmem:[#allocation0 + $0x8] sm:$0x3] %v69_v6 }
   0x6   :  { %40 = vst [vmem:[#allocation0] sm:$0x3] %v39_v7  ;;  %s71_s0 = smov 8  }
   0xb   :  { %v42_v8 = vld [vmem:[#allocation0] ss:$8 sm:$0xf0]   ;;  %v50_v9 = vld [vmem:[#allocation0 + $0x1] ss:$8 sm:$0xf0]  }
   0xd   :  { %v41_v10 = vld [vmem:[#allocation0] ss:$8 sm:$0xf]   ;;  %v48_v11 = vld [vmem:[#allocation0 + $0x1] ss:$8 sm:$0xf]  }
   0xe   :  { %v44_v12 = vsel %vm43_vm0, %v42_v8, %v41_v10  ;;  %v52_v13 = vsel %vm43_vm0, %v50_v9, %v48_v11 }
   0xf   :  { %53 = vrot.lane.b32.xlu0 %v52_v13, %s71_s0  ;;  %46 = vst.msk [vmem:[%s113_s1] sm:$0xff] %vm45_vm1, %v44_v12  }
  0x81   :  { %v54_v14 = vpop.permute.xlu0 %53  }
  0x82   :  { %56 = vst.msk [vmem:[%s113_s1] sm:$0xff] %vm55_vm2, %v54_v14  }

// kernel: llama_forward.1
= control target key start
LH: loop header
LB: loop body
LE: loop exit
PB: predicated region body
PF: predicated region fallthrough
CT: control target
= control target key end

     0   :  { %s2609_s0 = inlined_call_operand.vmem [shape: f32[2,8,128], index: 0, kind: input, shape index: {}]   ;;  %s2610_s1 = inlined_call_operand.vmem [shape: f32[16,48], index: 1, kind: input, shape index: {}]   ;;  %s2611_s2 = inlined_call_operand.vmem [shape: f32[16,48], index: 2, kind: input, shape index: {}]   ;;  %s2612_s3 = inlined_call_operand.vmem [shape: f32[8,32], index: 3, kind: input, shape index: {}]   ;;  %s2613_s4 = inlined_call_operand.vmem [shape: f32[32,32], index: 4, kind: input, shape index: {}]   ;;  %s2614_s5 = inlined_call_operand.vmem [shape: f32[16,32], index: 5, kind: input, shape index: {}]   ;;  %s2615_s6 = inlined_call_operand.vmem [shape: f32[1,128], index: 6, kind: input, shape index: {}]   ;;  %s2616_s7 = inlined_call_operand.vmem [shape: bf16[128,128], index: 7, kind: input, shape index: {}]   ;;  %s2617_s8 = inlined_call_operand.vmem [shape: f32[2,2,128], index: 8, kind: input, shape index: {}]   ;;  %s2618_s9 = inlined_call_operand.vmem [shape: bf16[2,128,128], index: 9, kind: input, shape index: {}]   ;;  %s2619_s10 = inlined_call_operand.vmem [shape: bf16[2,32,128], index: 10, kind: input, shape index: {}]   ;;  %s2620_s11 = inlined_call_operand.vmem [shape: bf16[2,128,256], index: 11, kind: input, shape index: {}]   ;;  %s2621_s12 = inlined_call_operand.vmem [shape: bf16[2,128,128], index: 12, kind: input, shape index: {}]   ;;  %s2622_s13 = inlined_call_operand.hbm [shape: f32[2,8,128], index: 13, kind: output, shape index: {}]  }
   0x1   :  { %2624 = sst [smem:[#allocation7_spill]] %s2622_s13 }
   0x2   :  { %18 = vsyncpa [#allocation4], 0  ;;  %s2309_s25 = smov 0  }
   0x3 LB: > { %2625 = sst [smem:[#allocation6_spill]] %s2225_s25  ;;  %s2315_s26 = sadd.s32 4294967295, %s2225_s25   ;;  %s2225_s25 = sphi %s2309_s25, %s24_s25  }
   0x4   : > { %p1815_p0 = scmp.ge.s32.totalorder %s2225_s25, 1  ;;  %p422_p1 = scmp.lt.s32.totalorder %s2225_s25, 3 }
   0x6   : > { %p423_p2 = pnand %p1815_p0, %p422_p1 }
   0x7   : > { %p480_p3 = scmp.lt.s32.totalorder (!%p423_p2), %s2315_s26, 1  ;;  %p1825_p4 = scmp.ne.s32.totalorder (!%p423_p2), %s2315_s26, 0 }
   0x8   : > { %426 = sbr.rel (%p423_p2) target bundleno = 2612 (0xa34), region = 72 }
   0xd   : > { %s481_s27 = scalar_select %p480_p3, %s2315_s26, 1 }
   0xf   : > { %s1816_s28 = sshll.u32 %s481_s27, 1  ;;  %s1893_s29 = sshll.u32 %s481_s27, 6 }
  0x10   : > { %s2324_s15 = scalar_lea.vmem %s2617_s8, %s1816_s28  ;;  %s2329_s18 = scalar_lea.vmem %s2618_s9, %s1893_s29 }
  0x11   : > { %s1894_s19 = sshll.u32 %s481_s27, 4  ;;  %s1895_s20 = sshll.u32 %s481_s27, 7 }
  0x12   : > { %s2334_s23 = scalar_lea.vmem %s2619_s10, %s1894_s19  ;;  %s2339_s13 = scalar_lea.vmem %s2620_s11, %s1895_s20 }
  0x13   : > { %s2344_s14 = scalar_lea.vmem %s2621_s12, %s1893_s29  ;;  %508 = sbr.rel (%p1825_p4) target bundleno = 26 (0x1a), region = 76 }
  0x18   : > { %v509_v0 = vld [vmem:[%s2609_s0] sm:$0xff]  ;;  %v510_v1 = vld [vmem:[%s2609_s0 + $0x8] sm:$0xff] }
  0x19   : > { %511 = vst [vmem:[#allocation2] sm:$0xff] %v509_v0  ;;  %512 = vst [vmem:[#allocation2 + $0x8] sm:$0xff] %v510_v1 }
  0x1a PF: > { %v2227_v5 = vmov 0.0   ;;  %v2113_v6 = vld [vmem:[%s2329_s18 + $0x38] sm:$0xff]   ;;  %v2114_v8 = vld [vmem:[%s2329_s18 + $0x30] sm:$0xff]   ;;  %v2115_v9 = vld [vmem:[%s2329_s18 + $0x28] sm:$0xff]   ;;  %vm2228_vm0 = vmmov 0   ;;  %v542_v15 = vlaneseq  ;;  %s2229_s20 = smov 48  }
  0x1b   : > { %1957 = vmatprep.subr.bf16.mxu0 %v2227_v5  ;;  %v2116_v10 = vld [vmem:[%s2329_s18 + $0x20] sm:$0xff]   ;;  %v2117_v11 = vld [vmem:[%s2329_s18 + $0x18] sm:$0xff]   ;;  %1973 = vmatprep.mubr.msk.bf16.mxu0 %vm2228_vm0, %v2227_v5  ;;  %v2118_v12 = vld [vmem:[%s2329_s18 + $0x10] sm:$0xff]   ;;  %s2231_s30 = smov 96   ;;  %vm682_vm1 = vcmask 130048   ;;  %s2232_s16 = smov 32  }
  0x1c   : > { %1958 = vmatpush3.bf16.msra.mxu0 %v2113_v6  ;;  %v2119_v13 = vld [vmem:[%s2329_s18 + $0x8] sm:$0xff]   ;;  %v2120_v14 = vld [vmem:[%s2329_s18] sm:$0xff]   ;;  %v543_v16 = vshrl.u32 %v542_v15, 7  ;;  %v2423_v56 = vld [vmem:[%s2613_s4 + $0x18] sm:$0xff]  ;;  %vm794_vm2 = vcmask 261120   ;;  %p1879_p5 = scmp.ne.s32.totalorder %s2315_s26, 1 }
  0x1d   : > { %1959 = vmatprep.subr.bf16.mxu0 %v2227_v5  ;;  %v518_v18 = vld [vmem:[%s2611_s2] sm:$0xff]  ;;  %v519_v21 = vld [vmem:[%s2611_s2 + $0x8] sm:$0xff]  ;;  %v2429_v57 = vld [vmem:[%s2613_s4 + $0x10] sm:$0xff] }
  0x1e   : > { %v1311_v17 = vsub.s32 1, %v543_v16  ;;  %v515_v19 = vld [vmem:[%s2324_s15] sm:$0x3]  ;;  %658 = vrot.lane.b32.xlu1 %v518_v18, %s2229_s20  ;;  %v544_v28 = vsub.s32 0, %v543_v16  ;;  %s2230_s15 = smov 80   ;;  %v526_v46 = vld [vmem:[%s2614_s5 + $0x8] sm:$0xff] }
  0x1f   : > { %v2401_v43 = vld [vmem:[%s2613_s4] sm:$0xff]  ;;  %1977 = vmatprep.subr.mxu1 %v526_v46  ;;  %v517_v51 = vld [vmem:[%s2610_s1 + $0x8] sm:$0xff] }
  0x20   : > { %v2353_v2 = vld [vmem:[#allocation2] sm:$0xff]  ;;  %v2355_v3 = vld [vmem:[#allocation2 + $0x8] sm:$0xff]  ;;  %1960 = vmatpush3.bf16.msra.mxu0 %v2114_v8  ;;  %v2384_v20 = vrot.slane %v515_v19, %v1311_v17  ;;  %v545_v31 = vrot.slane %v515_v19, %v544_v28  ;;  %1978 = vmatpush3.msra.mxu1 %v526_v46 }
  0x21   : > { %v527_v4 = vmul.f32 %v2353_v2, %v2353_v2  ;;  %v528_v7 = vmul.f32 %v2355_v3, %v2355_v3  ;;  %1961 = vmatprep.subr.bf16.mxu0 %v2227_v5  ;;  %v525_v47 = vld [vmem:[%s2614_s5] sm:$0xff]  ;;  %v2435_v58 = vld [vmem:[%s2613_s4 + $0x8] sm:$0xff] }
  0x22   : > { %660 = vrot.lane.b32.xlu1 %v519_v21, %s2229_s20  ;;  %1979 = vmatprep.subr.mxu1 %v525_v47  ;;  %v516_v48 = vld [vmem:[%s2610_s1] sm:$0xff] }
  0x23   : > { %529 = vadd.xlane.f32.xlu0 %v527_v4  ;;  %1980 = vmatpush3.msra.mxu1 %v525_v47  ;;  %v520_v18 = vld [vmem:[%s2612_s3] sm:$0xff] }
  0x24   : > { %1962 = vmatpush3.bf16.msra.mxu0 %v2115_v9  ;;  %1984 = vmatprep.subr.mxu1 %v2227_v5 }
  0x25   : > { %1963 = vmatprep.subr.bf16.mxu0 %v2227_v5 }
  0x27   : > { %531 = vadd.xlane.f32.xlu0 %v528_v7 }
  0x28   : > { %1964 = vmatpush3.bf16.msra.mxu0 %v2116_v10 }
  0x29   : > { %1965 = vmatprep.subr.bf16.mxu0 %v2227_v5 }
  0x2c   : > { %1966 = vmatpush3.bf16.msra.mxu0 %v2117_v11 }
  0x2d   : > { %1967 = vmatprep.subr.bf16.mxu0 %v2227_v5 }
  0x30   : > { %1968 = vmatpush3.bf16.msra.mxu0 %v2118_v12 }
  0x31   : > { %1969 = vmatprep.subr.bf16.mxu0 %v2227_v5 }
  0x34   : > { %1970 = vmatpush3.bf16.msra.mxu0 %v2119_v13 }
  0x35   : > { %1971 = vmatprep.subr.bf16.mxu0 %v2227_v5 }
  0x38   : > { %1972 = vmatpush3.bf16.msra.mxu0 %v2120_v14 }
  0x39   : > { %2006 = vmatprep.subr.mxu0 %v2227_v5 }
  0x90   : > { %v659_v37 = vpop.permute.xlu1 %658 }
  0x94   : > { %v661_v41 = vpop.permute.xlu1 %660 }
  0xac   : > { %v530_v22 = vpop.xlane.xlu0 %529 }
  0xad   : > { %v534_v23 = vmul.f32 0.03125, %v530_v22 }
  0xaf   : > { %v536_v24 = vadd.f32 1e-06, %v534_v23 }
  0xb0   : > { %v532_v25 = vpop.xlane.xlu0 %531 }
  0xb1   : > { %2155 = vrsqrt.f32 %v536_v24  ;;  %v535_v26 = vmul.f32 0.03125, %v532_v25 }
  0xb3   : > { %v537_v27 = vadd.f32 1e-06, %v535_v26 }
  0xb5   : > { %2157 = vrsqrt.f32 %v537_v27 }
  0xbe   : > { %v2156_v29 = vpop.eup %2155 }
  0xbf   : > { %v540_v30 = vmul.f32 %v2156_v29, %v2353_v2 }
  0xc1   : > { %v546_v34 = vmul.f32 %v545_v31, %v540_v30 }
  0xc2   : > { %v2158_v32 = vpop.eup %2157 }
  0xc3   : > { %v541_v33 = vmul.f32 %v2158_v32, %v2355_v3 }
  0xc5   : > { %v547_v35 = vmul.f32 %v545_v31, %v541_v33 }
  0xc7   : > { %v548_v36 = vpack.c.bf16 %v547_v35, %v546_v34 }
  0xc9   : > { %1974 = vmatmul.mubr.bf16.vlgmr.msra.gmra.mxu0 %v548_v36 }
  0xca   : > { %2014 = vmatprep.mubr.msk.f32.mxu0 %vm2228_vm0, %v2227_v5 }
 0x189   : > { %v2393_v38 = vpop.f32.mrf.mxu0 }
 0x18a   : > { %v664_v39 = vmul.f32 %v659_v37, %v2393_v38  ;;  %v654_v49 = vmul.f32 %v2393_v38, %v516_v48 }
 0x18b   : > { %v1975_v40 = vpop.f32.mrf.mxu0 }
 0x18c   : > { %668 = vrot.lane.b32.xlu0 %v664_v39, %s2230_s15 }
 0x18d   : > { %v2396_v42 = vpop.f32.mrf.mxu0 }
 0x18e   : > { %v665_v44 = vmul.f32 %v661_v41, %v2396_v42  ;;  %v655_v53 = vmul.f32 %v2396_v42, %v517_v51 }
 0x18f   : > { %v1976_v45 = vpop.f32.mrf.mxu0 }
 0x190   : > { %774 = vrot.lane.b32.xlu0 %v2401_v43, %s2231_s30  ;;  %670 = vrot.lane.b32.xlu1 %v665_v44, %s2230_s15 }
 0x1fe   : > { %v669_v50 = vpop.permute.xlu0 %668 }
 0x1ff   : > { %v674_v52 = vadd.f32 %v669_v50, %v654_v49  ;;  %v2121_v49 = vld [vmem:[%s2334_s23 + $0x8] sm:$0xff]   ;;  %v2122_v50 = vld [vmem:[%s2334_s23] sm:$0xff]  }
 0x201   : > { %678 = vrot.lane.b32.xlu1 %v674_v52, %s2231_s30 }
 0x202   : > { %v671_v54 = vpop.permute.xlu1 %670  ;;  %v775_v1 = vpop.permute.xlu0 %774 }
 0x203   : > { %v675_v55 = vadd.f32 %v671_v54, %v655_v53  ;;  %v786_v31 = vmul.f32 %v775_v1, %v2393_v38  ;;  %v790_v33 = vmul.f32 %v775_v1, %v2396_v42 }
 0x205   : > { %680 = vrot.lane.b32.xlu1 %v675_v55, %s2231_s30 }
 0x209   : > { %780 = vrot.lane.b32.xlu1 %v2423_v56, %s2231_s30 }
 0x20d   : > { %778 = vrot.lane.b32.xlu1 %v2429_v57, %s2231_s30 }
 0x211   : > { %776 = vrot.lane.b32.xlu1 %v2435_v58, %s2231_s30 }
 0x273   : > { %v679_v59 = vpop.permute.xlu1 %678 }
 0x274   : > { %1981 = vmatprep.mubr.msk.f32.mxu1 %vm682_vm1, %v679_v59 }
 0x277   : > { %v681_v60 = vpop.permute.xlu1 %680 }
 0x278   : > { %1982 = vmatmul.mubr.msk.f32.vlgmr.msra.gmra.mxu1 %vm682_vm1, %v681_v60 }
 0x279   : > { %1992 = vmatprep.mubr.msk.f32.mxu1 %vm2228_vm0, %v2227_v5 }
 0x27b   : > { %v781_v61 = vpop.permute.xlu1 %780 }
 0x27c   : > { %v789_v62 = vmul.f32 %v781_v61, %v2393_v38  ;;  %v793_v29 = vmul.f32 %v781_v61, %v2396_v42  ;;  %v2123_v61 = vld [vmem:[%s2339_s13 + $0x70] ss:$8 sps:$4 sm:$0xff]  }
 0x27e   : > { %985 = vrot.lane.b32.xlu0 %v789_v62, %s2232_s16  ;;  %v2125_v62 = vld [vmem:[%s2339_s13 + $0x74] ss:$8 sps:$4 sm:$0xff]  }
 0x27f   : > { %v779_v63 = vpop.permute.xlu1 %778 }
 0x280   : > { %v788_v0 = vmul.f32 %v779_v63, %v2393_v38  ;;  %v792_v32 = vmul.f32 %v779_v63, %v2396_v42 }
 0x282   : > { %983 = vrot.lane.b32.xlu1 %v788_v0, %s2232_s16 }
 0x283   : > { %v777_v4 = vpop.permute.xlu1 %776 }
 0x284   : > { %v787_v27 = vmul.f32 %v777_v4, %v2393_v38  ;;  %v791_v30 = vmul.f32 %v777_v4, %v2396_v42 }
 0x2f0   : > { %v986_v6 = vpop.permute.xlu0 %985 }
 0x2f1   : > { %2007 = vmatpush3.msra.mxu0 %v986_v6 }
 0x2f2   : > { %2008 = vmatprep.subr.mxu0 %v2227_v5 }
 0x2f4   : > { %v984_v7 = vpop.permute.xlu1 %983 }
 0x2f5   : > { %2009 = vmatpush3.msra.mxu0 %v984_v7 }
 0x2f6   : > { %2010 = vmatprep.subr.mxu0 %v2227_v5 }
 0x338   : > { %v1983_v8 = vpop.f32.mrf.mxu1 }
 0x339   : > { %v769_v14 = vmul.f32 %v1983_v8, %v2423_v56  ;;  %v768_v15 = vmul.f32 %v1983_v8, %v2429_v57  ;;  %v767_v16 = vmul.f32 %v1983_v8, %v2435_v58  ;;  %v766_v17 = vmul.f32 %v1983_v8, %v2401_v43 }
 0x33a   : > { %v753_v9 = vpop.f32.mrf.mxu1 }
 0x33b   : > { %v765_v10 = vmul.f32 %v753_v9, %v2423_v56  ;;  %v764_v11 = vmul.f32 %v753_v9, %v2429_v57  ;;  %v763_v12 = vmul.f32 %v753_v9, %v2435_v58  ;;  %v762_v13 = vmul.f32 %v753_v9, %v2401_v43 }
 0x33d   : > { %1985 = vmatpush3.xpose.msk.msra.mxu1 %vm794_vm2, %v765_v10  ;;  %v2126_v10 = vld [vmem:[%s2339_s13 + $0x60] ss:$8 sps:$4 sm:$0xff]  }
 0x33e   : > { %1986 = vmatprep.subr.mxu1 %v2227_v5 }
 0x341   : > { %1987 = vmatpush3.xpose.msk.msra.mxu1 %vm794_vm2, %v764_v11  ;;  %v2131_v11 = vld [vmem:[%s2339_s13 + $0x54] ss:$8 sps:$4 sm:$0xff]  }
 0x342   : > { %1988 = vmatprep.subr.mxu1 %v2227_v5 }
 0x345   : > { %1989 = vmatpush3.xpose.msk.msra.mxu1 %vm794_vm2, %v763_v12  ;;  %v2129_v12 = vld [vmem:[%s2339_s13 + $0x50] ss:$8 sps:$4 sm:$0xff]  }
 0x346   : > { %1990 = vmatprep.subr.mxu1 %v2227_v5 }
 0x349   : > { %1991 = vmatpush3.xpose.msk.msra.mxu1 %vm794_vm2, %v762_v13  ;;  %v2132_v13 = vld [vmem:[%s2339_s13 + $0x40] ss:$8 sps:$4 sm:$0xff]  }
 0x34a   : > { %1995 = vmatprep.subr.mxu1 %v2227_v5 }
 0x34c   : > { %1993 = vmatmul.mubr.msk.f32.vlgmr.msra.gmra.mxu1 %vm794_vm2, %v674_v52 }
 0x34d   : > { %1996 = vmatpush3.xpose.msk.msra.mxu1 %vm794_vm2, %v769_v14  ;;  %2003 = vmatprep.mubr.msk.f32.mxu1 %vm2228_vm0, %v2227_v5  ;;  %v2137_v14 = vld [vmem:[%s2339_s13 + $0x34] ss:$8 sps:$4 sm:$0xff]  }
 0x34e   : > { %1997 = vmatprep.subr.mxu1 %v2227_v5 }
 0x351   : > { %1998 = vmatpush3.xpose.msk.msra.mxu1 %vm794_vm2, %v768_v15  ;;  %v2135_v15 = vld [vmem:[%s2339_s13 + $0x30] ss:$8 sps:$4 sm:$0xff]  }
 0x352   : > { %1999 = vmatprep.subr.mxu1 %v2227_v5 }
 0x355   : > { %2000 = vmatpush3.xpose.msk.msra.mxu1 %vm794_vm2, %v767_v16  ;;  %v2140_v16 = vld [vmem:[%s2339_s13 + $0x24] ss:$8 sps:$4 sm:$0xff]  }
 0x356   : > { %2001 = vmatprep.subr.mxu1 %v2227_v5 }
 0x359   : > { %2002 = vmatpush3.xpose.msk.msra.mxu1 %vm794_vm2, %v766_v17  ;;  %v2233_v17 = vmov 0  }
 0x35a   : > { %2017 = vmatprep.subr.mxu1 %v2227_v5 }
 0x35c   : > { %2004 = vmatmul.mubr.msk.f32.vlgmr.msra.gmra.mxu1 %vm794_vm2, %v675_v55 }
 0x35d   : > { %2025 = vmatprep.mubr.msk.f32.mxu1 %vm2228_vm0, %v2227_v5 }
 0x40c   : > { %v875_v19 = vpop.f32.mrf.mxu1 }
 0x40d   : > { %v876_v21 = vadd.f32 %v875_v19, %v520_v18  ;;  %v2143_v19 = vld [vmem:[%s2339_s13 + $0x14] ss:$8 sps:$4 sm:$0xff]  }
 0x40e   : > { %v1994_v22 = vpop.f32.mrf.mxu1 }
 0x40f   : > { %v963_v23 = vsel %vm794_vm2, %v876_v21, -inf  ;;  %v2146_v22 = vld [vmem:[%s2339_s13 + $0x4] ss:$8 sps:$4 sm:$0xff]  }
 0x410   : > { %964 = vmax.xlane.f32.xlu1 %v963_v23  ;;  %v2144_v23 = vld [vmem:[%s2339_s13] ss:$8 sps:$4 sm:$0xff]  }
 0x41c   : > { %v959_v24 = vpop.f32.mrf.mxu1 }
 0x41d   : > { %v960_v25 = vadd.f32 %v959_v24, %v520_v18  ;;  %v2138_v18 = vld [vmem:[%s2339_s13 + $0x20] ss:$8 sps:$4 sm:$0xff]  }
 0x41e   : > { %v2005_v26 = vpop.f32.mrf.mxu1 }
 0x41f   : > { %v966_v28 = vsel %vm794_vm2, %v960_v25, -inf }
 0x420   : > { %967 = vmax.xlane.f32.xlu0 %v966_v28 }
 0x421   : > { %981 = vrot.lane.b32.xlu1 %v787_v27, %s2232_s16 }
 0x425   : > { %1074 = vrot.lane.b32.xlu1 %v793_v29, %s2232_s16 }
 0x429   : > { %1070 = vrot.lane.b32.xlu1 %v791_v30, %s2232_s16 }
 0x436   : > { %979 = vrot.lane.b32.xlu0 %v786_v31, %s2232_s16 }
 0x43a   : > { %1072 = vrot.lane.b32.xlu0 %v792_v32, %s2232_s16 }
 0x43e   : > { %1068 = vrot.lane.b32.xlu0 %v790_v33, %s2232_s16 }
 0x499   : > { %v965_v34 = vpop.xlane.xlu1 %964 }
 0x49a   : > { %v969_v35 = vsub.f32 %v876_v21, %v965_v34  ;;  %v2141_v21 = vld [vmem:[%s2339_s13 + $0x10] ss:$8 sps:$4 sm:$0xff]  }
 0x49c   : > { %v971_v36 = vmul.f32 1.442695, %v969_v35 }
 0x49d   : > { %v982_v37 = vpop.permute.xlu1 %981 }
 0x49e   : > { %2011 = vmatpush3.msra.mxu0 %v982_v37  ;;  %2159 = vpow2.f32 %v971_v36  ;;  %v2147_v37 = vld [vmem:[%s2344_s14 + $0x38] sm:$0xff]  }
 0x49f   : > { %2012 = vmatprep.subr.mxu0 %v2227_v5 }
 0x4a1   : > { %v1075_v39 = vpop.permute.xlu1 %1074 }
 0x4a2   : > { %2018 = vmatpush3.msra.mxu1 %v1075_v39  ;;  %v2148_v39 = vld [vmem:[%s2344_s14 + $0x30] sm:$0xff]  }
 0x4a3   : > { %2019 = vmatprep.subr.mxu1 %v2227_v5 }
 0x4a5   : > { %v1071_v46 = vpop.permute.xlu1 %1070 }
 0x4a9   : > { %v968_v38 = vpop.xlane.xlu0 %967 }
 0x4aa   : > { %v970_v40 = vsub.f32 %v960_v25, %v968_v38  ;;  %v2149_v38 = vld [vmem:[%s2344_s14 + $0x28] sm:$0xff]  }
 0x4ab   : > { %v2160_v45 = vpop.eup %2159 }
 0x4ac   : > { %v973_v41 = vmul.f32 1.442695, %v970_v40  ;;  %v2150_v40 = vld [vmem:[%s2344_s14 + $0x20] sm:$0xff]  }
 0x4ad   : > { %v980_v44 = vpop.permute.xlu0 %979 }
 0x4ae   : > { %2161 = vpow2.f32 %v973_v41  ;;  %2013 = vmatpush3.msra.mxu0 %v980_v44  ;;  %v2152_v41 = vld [vmem:[%s2344_s14 + $0x10] sm:$0xff]   ;;  %v2153_v44 = vld [vmem:[%s2344_s14 + $0x8] sm:$0xff]  }
 0x4af   : > { %2015 = vmatmul.mubr.msk.f32.vlgmr.msra.gmra.mxu0 %vm794_vm2, %v2160_v45  ;;  %2028 = vmatprep.subr.mxu0 %v2423_v56 }
 0x4b0   : > { %2036 = vmatprep.mubr.msk.f32.mxu0 %vm794_vm2, %v2160_v45  ;;  %2029 = vmatpush3.msra.mxu0 %v2423_v56  ;;  %v2154_v45 = vld [vmem:[%s2344_s14] sm:$0xff]  }
 0x4b1   : > { %v1073_v42 = vpop.permute.xlu0 %1072  ;;  %2030 = vmatprep.subr.mxu0 %v2429_v57 }
 0x4b2   : > { %2020 = vmatpush3.msra.mxu1 %v1073_v42  ;;  %2031 = vmatpush3.msra.mxu0 %v2429_v57 }
 0x4b3   : > { %2021 = vmatprep.subr.mxu1 %v2227_v5  ;;  %2032 = vmatprep.subr.mxu0 %v2435_v58 }
 0x4b4   : > { %2022 = vmatpush3.msra.mxu1 %v1071_v46  ;;  %2033 = vmatpush3.msra.mxu0 %v2435_v58 }
 0x4b5   : > { %v1069_v47 = vpop.permute.xlu0 %1068  ;;  %2023 = vmatprep.subr.mxu1 %v2227_v5  ;;  %2034 = vmatprep.subr.mxu0 %v2401_v43 }
 0x4b6   : > { %2024 = vmatpush3.msra.mxu1 %v1069_v47  ;;  %2035 = vmatpush3.msra.mxu0 %v2401_v43 }
 0x4b7   : > { %2039 = vmatprep.subr.bf16.mxu1 %v2227_v5  ;;  %1412 = vmatprep.subr.bf16.mxu0 %v2125_v62 }
 0x4bb   : > { %v2162_v48 = vpop.eup %2161 }
 0x4bc   : > { %2026 = vmatmul.mubr.msk.f32.vlgmr.msra.gmra.mxu1 %vm794_vm2, %v2162_v48  ;;  %2037 = vmatmul.mubr.msk.f32.vlgmr.msra.gmra.mxu0 %vm794_vm2, %v2162_v48 }
 0x4bd   : > { %2043 = vmatprep.mubr.msk.bf16.mxu1 %vm2228_vm0, %v2227_v5  ;;  %2040 = vmatpush3.bf16.msra.mxu1 %v2121_v49 }
 0x4be   : > { %2041 = vmatprep.subr.bf16.mxu1 %v2227_v5  ;;  %1413 = vmatpush1.bf16.msra.mxu0 %v2123_v61 }
 0x4bf   : > { %1444 = vmatprep.mubr.bf16.mxu0 %v2233_v17 }
 0x4c1   : > { %2042 = vmatpush3.bf16.msra.mxu1 %v2122_v50 }
 0x4c2   : > { %2047 = vmatprep.subr.bf16.mxu1 %v2227_v5 }
 0x56f   : > { %v1060_v43 = vpop.f32.mrf.mxu0 }
 0x571   : > { %v2016_v51 = vpop.f32.mrf.mxu0 }
 0x57c   : > { %v1149_v52 = vpop.f32.mrf.mxu1  ;;  %v2038_v53 = vpop.f32.mrf.mxu0 }
 0x57d   : > { %2163 = vrcp.f32 %v2038_v53 }
 0x57e   : > { %v2027_v54 = vpop.f32.mrf.mxu1  ;;  %v1219_v55 = vpop.f32.mrf.mxu0 }
 0x57f   : > { %2165 = vrcp.f32 %v1219_v55 }
 0x58a   : > { %v2164_v56 = vpop.eup %2163 }
 0x58b   : > { %v1231_v59 = vmul.f32 %v2164_v56, %v1149_v52 }
 0x58c   : > { %v2166_v57 = vpop.eup %2165 }
 0x58d   : > { %v1230_v58 = vmul.f32 %v2166_v57, %v1060_v43 }
 0x58f   : > { %v1232_v60 = vpack.c.bf16 %v1231_v59, %v1230_v58 }
 0x591   : > { %2044 = vmatmul.mubr.msk.bf16.vlgmr.msra.gmra.mxu1 %vm794_vm2, %v1232_v60 }
 0x592   : > { %2063 = vmatprep.mubr.msk.bf16.mxu1 %vm2228_vm0, %v2227_v5  ;;  %2048 = vmatpush3.bf16.msra.mxu1 %v2147_v37 }
 0x593   : > { %2049 = vmatprep.subr.bf16.mxu1 %v2227_v5 }
 0x596   : > { %2050 = vmatpush3.bf16.msra.mxu1 %v2148_v39 }
 0x597   : > { %2051 = vmatprep.subr.bf16.mxu1 %v2227_v5 }
 0x59a   : > { %2052 = vmatpush3.bf16.msra.mxu1 %v2149_v38 }
 0x59b   : > { %2053 = vmatprep.subr.bf16.mxu1 %v2227_v5 }
 0x59e   : > { %2054 = vmatpush3.bf16.msra.mxu1 %v2150_v40 }
 0x59f   : > { %2055 = vmatprep.subr.bf16.mxu1 %v2227_v5 }
 0x651   : > { %v1286_v63 = vpop.f32.mrf.mxu1 }
 0x652   : > { %v2522_v0 = vadd.f32 %v1286_v63, %v2353_v2  ;;  %v2128_v2 = vld [vmem:[%s2339_s13 + $0x64] ss:$8 sps:$4 sm:$0xff]  }
 0x653   : > { %v2045_v1 = vpop.f32.mrf.mxu1  ;;  %1414 = vmatprep.subr.bf16.mxu0 %v2128_v2 }
 0x654   : > { %v1295_v4 = vmul.f32 %v2522_v0, %v2522_v0  ;;  %1415 = vmatpush1.bf16.msra.mxu0 %v2126_v10 }
 0x655   : > { %v1289_v6 = vpop.f32.mrf.mxu1  ;;  %1416 = vmatprep.subr.bf16.mxu0 %v2131_v11 }
 0x656   : > { %v2527_v7 = vadd.f32 %v1289_v6, %v2355_v3  ;;  %1297 = vadd.xlane.f32.xlu1 %v1295_v4  ;;  %v2134_v3 = vld [vmem:[%s2339_s13 + $0x44] ss:$8 sps:$4 sm:$0xff]  }
 0x657   : > { %v2046_v8 = vpop.f32.mrf.mxu1 }
 0x658   : > { %v1296_v9 = vmul.f32 %v2527_v7, %v2527_v7  ;;  %1417 = vmatpush1.bf16.msra.mxu0 %v2129_v12 }
 0x659   : > { %1418 = vmatprep.subr.bf16.mxu0 %v2134_v3 }
 0x65a   : > { %1299 = vadd.xlane.f32.xlu0 %v1296_v9 }
 0x65c   : > { %1419 = vmatpush1.bf16.msra.mxu0 %v2132_v13 }
 0x65d   : > { %1420 = vmatprep.subr.bf16.mxu0 %v2137_v14 }
 0x660   : > { %1421 = vmatpush1.bf16.msra.mxu0 %v2135_v15 }
 0x661   : > { %1422 = vmatprep.subr.bf16.mxu0 %v2140_v16 }
 0x664   : > { %1423 = vmatpush1.bf16.msra.mxu0 %v2138_v18 }
 0x665   : > { %1424 = vmatprep.subr.bf16.mxu0 %v2143_v19 }
 0x668   : > { %1425 = vmatpush1.bf16.msra.mxu0 %v2141_v21 }
 0x669   : > { %1426 = vmatprep.subr.bf16.mxu0 %v2146_v22 }
 0x66c   : > { %1427 = vmatpush1.bf16.msra.mxu0 %v2144_v23 }
 0x6df   : > { %v1298_v24 = vpop.xlane.xlu1 %1297 }
 0x6e0   : > { %v1301_v25 = vmul.f32 0.03125, %v1298_v24 }
 0x6e2   : > { %v1303_v26 = vadd.f32 1e-06, %v1301_v25 }
 0x6e3   : > { %v1300_v27 = vpop.xlane.xlu0 %1299 }
 0x6e4   : > { %2167 = vrsqrt.f32 %v1303_v26  ;;  %v1302_v28 = vmul.f32 0.03125, %v1300_v27 }
 0x6e6   : > { %v1304_v29 = vadd.f32 1e-06, %v1302_v28 }
 0x6e8   : > { %2169 = vrsqrt.f32 %v1304_v29 }
 0x6f1   : > { %v2168_v30 = vpop.eup %2167 }
 0x6f2   : > { %v1307_v31 = vmul.f32 %v2168_v30, %v2522_v0 }
 0x6f4   : > { %v1313_v34 = vmul.f32 %v2384_v20, %v1307_v31 }
 0x6f5   : > { %v2170_v32 = vpop.eup %2169 }
 0x6f6   : > { %v1308_v33 = vmul.f32 %v2170_v32, %v2527_v7 }
 0x6f8   : > { %v1314_v35 = vmul.f32 %v2384_v20, %v1308_v33  ;;  %v2151_v20 = vld [vmem:[%s2344_s14 + $0x18] sm:$0xff]  }
 0x6f9   : > { %2056 = vmatpush3.bf16.msra.mxu1 %v2151_v20 }
 0x6fa   : > { %v1315_v36 = vpack.c.bf16 %v1314_v35, %v1313_v34  ;;  %2057 = vmatprep.subr.bf16.mxu1 %v2227_v5 }
 0x6fc   : > { %1445 = vmatmul.mubr.bf16.vlgmr.msra.gmra.mxu0 %v1315_v36 }
 0x6fd   : > { %2058 = vmatpush3.bf16.msra.mxu1 %v2152_v41 }
 0x6fe   : > { %2059 = vmatprep.subr.bf16.mxu1 %v2227_v5 }
 0x701   : > { %2060 = vmatpush3.bf16.msra.mxu1 %v2153_v44 }
 0x702   : > { %2061 = vmatprep.subr.bf16.mxu1 %v2227_v5 }
 0x705   : > { %2062 = vmatpush3.bf16.msra.mxu1 %v2154_v45 }
 0x7bc   : > { %v1446_v42 = vpop.f32.mrf.mxu0 }
 0x7bd   : > { %v1869_v46 = vmul.f32 -1.442695, %v1446_v42 }
 0x7be   : > { %v1448_v47 = vpop.f32.mrf.mxu0 }
 0x7bf   : > { %2171 = vpow2.f32 %v1869_v46 }
 0x7c0   : > { %v1450_v48 = vpop.f32.mrf.mxu0 }
 0x7c1   : > { %v1870_v49 = vmul.f32 -1.442695, %v1450_v48 }
 0x7c2   : > { %v1452_v5 = vpop.f32.mrf.mxu0 }
 0x7c3   : > { %2173 = vpow2.f32 %v1870_v49 }
 0x7cc   : > { %v2172_v50 = vpop.eup %2171 }
 0x7cd   : > { %v1461_v43 = vadd.f32 1.0, %v2172_v50 }
 0x7cf   : > { %2175 = vrcp.f32 %v1461_v43 }
 0x7d0   : > { %v2174_v51 = vpop.eup %2173 }
 0x7d1   : > { %v1462_v52 = vadd.f32 1.0, %v2174_v51 }
 0x7d3   : > { %2177 = vrcp.f32 %v1462_v52 }
 0x7dc   : > { %v2176_v53 = vpop.eup %2175 }
 0x7dd   : > { %v1467_v54 = vmul.f32 %v2176_v53, %v1446_v42 }
 0x7df   : > { %v1469_v57 = vmul.f32 %v1467_v54, %v1448_v47 }
 0x7e0   : > { %v2178_v55 = vpop.eup %2177 }
 0x7e1   : > { %v1468_v56 = vmul.f32 %v2178_v55, %v1450_v48 }
 0x7e3   : > { %v1470_v58 = vmul.f32 %v1468_v56, %v1452_v5 }
 0x7e5   : > { %v1471_v59 = vpack.c.bf16 %v1470_v58, %v1469_v57 }
 0x7e7   : > { %2064 = vmatmul.mubr.bf16.vlgmr.msra.gmra.mxu1 %v1471_v59 }
 0x8a7   : > { %v1570_v60 = vpop.f32.mrf.mxu1 }
 0x8a8   : > { %v1577_v61 = vadd.f32 %v1570_v60, %v2522_v0 }
 0x8a9   : > { %v2065_v62 = vpop.f32.mrf.mxu1 }
 0x8aa   : > { %1579 = vst [vmem:[#allocation2] sm:$0xff] %v1577_v61  ;;  %1584 = sbr.rel (%p1879_p5) target bundleno = 2590 (0xa1e), region = 80 }
 0x8ab   : > { %v1573_v63 = vpop.f32.mrf.mxu1 }
 0x8ac   : > { %v1578_v1 = vadd.f32 %v1573_v63, %v2527_v7 }
 0x8ad   : > { %v2066_v4 = vpop.f32.mrf.mxu1 }
 0x8ae   : > { %1580 = vst [vmem:[#allocation2 + $0x8] sm:$0xff] %v1578_v1 }
 0x8af   : > { %v1586_v6 = vmul.f32 %v1577_v61, %v1577_v61  ;;  %v2179_v8 = vld [vmem:[%s2616_s7 + $0x38] sm:$0xff]   ;;  %v2234_v9 = vmov 0.0   ;;  %v1587_v2 = vmul.f32 %v1578_v1, %v1578_v1  ;;  %v2180_v0 = vld [vmem:[%s2616_s7 + $0x30] sm:$0xff]   ;;  %v2181_v7 = vld [vmem:[%s2616_s7 + $0x28] sm:$0xff]   ;;  %vm2235_vm3 = vmmov 0  }
 0x8b0   : > { %2067 = vmatprep.subr.bf16.mxu0 %v2234_v9  ;;  %v2182_v10 = vld [vmem:[%s2616_s7 + $0x20] sm:$0xff]   ;;  %v2183_v11 = vld [vmem:[%s2616_s7 + $0x18] sm:$0xff]   ;;  %v2184_v12 = vld [vmem:[%s2616_s7 + $0x10] sm:$0xff]   ;;  %2083 = vmatprep.mubr.msk.bf16.mxu0 %vm2235_vm3, %v2234_v9 }
 0x8b1   : > { %1588 = vadd.xlane.f32.xlu0 %v1586_v6  ;;  %2068 = vmatpush3.bf16.msra.mxu0 %v2179_v8  ;;  %v2185_v3 = vld [vmem:[%s2616_s7 + $0x8] sm:$0xff]   ;;  %v2186_v13 = vld [vmem:[%s2616_s7] sm:$0xff]  }
 0x8b2   : > { %2069 = vmatprep.subr.bf16.mxu0 %v2234_v9  ;;  %v1880_v24 = vld [vmem:[%s2615_s6] ss:$0 sm:$0xff] }
 0x8b5   : > { %1590 = vadd.xlane.f32.xlu0 %v1587_v2  ;;  %2070 = vmatpush3.bf16.msra.mxu0 %v2180_v0 }
 0x8b6   : > { %2071 = vmatprep.subr.bf16.mxu0 %v2234_v9 }
 0x8b9   : > { %2072 = vmatpush3.bf16.msra.mxu0 %v2181_v7 }
 0x8ba   : > { %2073 = vmatprep.subr.bf16.mxu0 %v2234_v9 }
 0x8bd   : > { %2074 = vmatpush3.bf16.msra.mxu0 %v2182_v10 }
 0x8be   : > { %2075 = vmatprep.subr.bf16.mxu0 %v2234_v9 }
 0x8c1   : > { %2076 = vmatpush3.bf16.msra.mxu0 %v2183_v11 }
 0x8c2   : > { %2077 = vmatprep.subr.bf16.mxu0 %v2234_v9 }
 0x8c5   : > { %2078 = vmatpush3.bf16.msra.mxu0 %v2184_v12 }
 0x8c6   : > { %2079 = vmatprep.subr.bf16.mxu0 %v2234_v9 }
 0x8c9   : > { %2080 = vmatpush3.bf16.msra.mxu0 %v2185_v3 }
 0x8ca   : > { %2081 = vmatprep.subr.bf16.mxu0 %v2234_v9 }
 0x8cd   : > { %2082 = vmatpush3.bf16.msra.mxu0 %v2186_v13 }
 0x93a   : > { %v1589_v14 = vpop.xlane.xlu0 %1588 }
 0x93b   : > { %v1592_v15 = vmul.f32 0.03125, %v1589_v14 }
 0x93d   : > { %v1594_v16 = vadd.f32 1e-06, %v1592_v15 }
 0x93e   : > { %v1591_v17 = vpop.xlane.xlu0 %1590 }
 0x93f   : > { %2187 = vrsqrt.f32 %v1594_v16  ;;  %v1593_v18 = vmul.f32 0.03125, %v1591_v17 }
 0x941   : > { %v1595_v19 = vadd.f32 1e-06, %v1593_v18 }
 0x943   : > { %2189 = vrsqrt.f32 %v1595_v19 }
 0x94c   : > { %v2188_v21 = vpop.eup %2187 }
 0x94d   : > { %v1598_v22 = vmul.f32 %v2188_v21, %v1577_v61 }
 0x94f   : > { %v1606_v26 = vmul.f32 %v1880_v24, %v1598_v22 }
 0x950   : > { %v2190_v23 = vpop.eup %2189 }
 0x951   : > { %v1599_v25 = vmul.f32 %v2190_v23, %v1578_v1 }
 0x953   : > { %v1607_v27 = vmul.f32 %v1880_v24, %v1599_v25 }
 0x955   : > { %v1608_v28 = vpack.c.bf16 %v1607_v27, %v1606_v26 }
 0x957   : > { %2084 = vmatmul.mubr.bf16.vlgmr.msra.gmra.mxu0 %v1608_v28 }
 0xa17   : > { %v1707_v29 = vpop.f32.mrf.mxu0 }
 0xa18   : > { %1714 = vst [vmem:[#allocation3] sm:$0xff] %v1707_v29 }
 0xa19   : > { %v2085_v30 = vpop.f32.mrf.mxu0 }
 0xa1b   : > { %v1710_v31 = vpop.f32.mrf.mxu0 }
 0xa1c   : > { %1715 = vst [vmem:[#allocation3 + $0x8] sm:$0xff] %v1710_v31 }
 0xa1d   : > { %v2086_v32 = vpop.f32.mrf.mxu0 }
 0xa1e PF: > { %p2091_p6 = scmp.eq.s32.totalorder %s2315_s26, 1  ;;  %s2236_s23 = smov [#allocation3]  }
 0xa1f   : > { %s1722_s14 = sshll.u32 %s2236_s23, 4  ;;  %s1723_s14 = int_to_ptr.vmem [resolvable:$true] %s1722_s14 }
 0xa20   : > { %s2191_s17 = scalar_lea.vmem %s1723_s14, 256  ;;  %p2198_p10 = scmp.lt.s32.totalorder %s1723_s14, %s1723_s14 }
 0xa21   : > { %p2192_p7 = scmp.ne.s32.totalorder %s1723_s14, %s2191_s17  ;;  %p2199_p11 = scmp.lt.s32.totalorder %s2191_s17, %s2191_s17 }
 0xa23   : > { %p2193_p8 = pnand %p2192_p7, %p2091_p6  ;;  %p2200_p12 = por %p2199_p11, %p2198_p10 }
 0xa25   : > { %p2194_p9 = pneg %p2193_p8 }
 0xa27   : > { %p2201_p13 = pnand %p2200_p12, %p2194_p9 }
 0xa29   : > { %2204 = shalt.err (!%p2201_p13)
}
 0xa2a   : > { %s2237_s19 = smov 128   ;;  %s2238_s25 = smov 8  }
 0xa2b   : > { %s2626_s21 = sld [smem:[#allocation7_spill]] }
 0xa31   : > { %2088 = dma.vmem_to_hbm [thread:$0]  (%p2091_p6), %s1723_s14, 256, %s2626_s21, [#allocation4], %s2237_s19, %s2237_s19, %s2238_s25  }
 0xa32   : > { %2220 = dma.done.wait (%p2091_p6), [#allocation4], 256  }
 0xa33   : > { %2222 = vsyncadd (%p2091_p6), [#allocation4], 4294967040 }
 0xa34 PF: > { %s2627_s22 = sld [smem:[#allocation6_spill]] }
 0xa3a   : > { %s24_s25 = sadd.s32 1, %s2627_s22  }
 0xa3b   : > { %p21_p0 = scmp.ge.s32.totalorder %s24_s25, 4  }
 0xa3d   :  { %23 = sbr.rel (!%p21_p0) target bundleno = 3 (0x3), region = 119 }
 0xa42   :  { %1738 = vsyncpa [#allocation4], 1 }
 0xa43   :  { %1740 = vsyncpa [#allocation4 + $0x1], 1 }

</bundles_post_ra>
